<compile_context>
chip_gen: v5e
topology: v5e:2x2
jax: 0.10.0
libtpu: 0.0.40
codegen_flags: <defaults>
</compile_context>

<pallas_src>
import functools

import jax
import jax.numpy as jnp
import numpy as np
from jax.experimental import pallas as pl
from jax.experimental.pallas import tpu as pltpu

EPS = 1e-5                      # nn.BatchNorm2d default eps
VMEM_LIMIT = 32 * 1024 * 1024   # explicit scoped-VMEM limit (safe on v5e/v6e/v7x)


def _round_up(a, b):
    return (a + b - 1) // b * b


def _conv_stats_kernel(p_ref, w_ref, y_ref, sum_ref, ssq_ref):
    """Pass 1: y_t = W_t @ patches_T (channel-major (Cout_sub, tm) tile);
    write the y tile and accumulate per-channel sum / sum-of-squares into the
    per-parallel-slice resident (Cout_sub, 1) blocks."""
    i = pl.program_id(1)

    y = jnp.dot(w_ref[...], p_ref[...], preferred_element_type=jnp.float32)
    y_ref[...] = y

    @pl.when(i == 0)
    def _():
        sum_ref[...] = jnp.zeros_like(sum_ref)
        ssq_ref[...] = jnp.zeros_like(ssq_ref)

    # No conv bias is added (it cancels inside BatchNorm), so zero-padded pixel columns and
    # zero-padded contraction rows contribute exactly 0 -> no masking needed.
    sum_ref[...] += jnp.sum(y, axis=1, keepdims=True)      # cross-lane reduce (XLU)
    ssq_ref[...] += jnp.sum(y * y, axis=1, keepdims=True)


def _bn_act_kernel(y_ref, scale_ref, shift_ref, o_ref, *, activation):
    """Pass 2: z = y * scale + shift (per-channel, i.e. per-sublane-row), then activation."""
    z = y_ref[...] * scale_ref[...] + shift_ref[...]
    if activation == "relu":
        o_ref[...] = jnp.maximum(z, 0.0)
    else:  # sigmoid
        o_ref[...] = 1.0 / (1.0 + jnp.exp(-z))


def decoder_module_forward(x, weight, bias, gamma, beta, stride, pad,
                           *, activation="relu", tm=1024):
    """x: (N, Cin, H, W) NCHW; weight: (Cin, Cout, K, K) torch ConvTranspose2d layout.

    Forward of DecoderModule in training mode: convT -> BatchNorm2d(batch stats) -> activation.
    The conv bias is accepted for API fidelity but not used: an additive per-channel constant
    before BatchNorm cancels exactly in (y - mean)."""
    del bias
    N, Cin, H, W = x.shape
    _, Cout, K, _ = weight.shape
    s = int(stride)
    OH = (H - 1) * s - 2 * pad + K
    OW = (W - 1) * s - 2 * pad + K
    M = N * OH * OW
    CKK = Cin * K * K

    cout_sub = _round_up(Cout, 8)        # sublane-pad the (small) channel axis only
    ckk_pad = _round_up(CKK, 16)         # bf16 sublane packing of the contraction axis

    # Tile the flattened pixel axis (lane dimension). Keep tm a multiple of 128, clamp to data,
    # and cap it so the double-buffered patch block stays within a conservative VMEM budget
    # (matters for large Cin*K*K, especially on v7x's 64 MiB VMEM).
    tm = _round_up(max(128, min(tm, _round_up(M, 128))), 128)
    max_block_bytes = 8 * 1024 * 1024
    tm_cap = max(128, (max_block_bytes // (2 * 2 * ckk_pad)) // 128 * 128)
    tm = min(tm, tm_cap)

    n_tiles = pl.cdiv(M, tm)
    n_par = 2 if n_tiles >= 2 else 1     # v7x: split pass 1 across the two TensorCores
    n_inner = pl.cdiv(n_tiles, n_par)
    n_tiles = n_par * n_inner
    m_pad = n_tiles * tm

    # ---- transposed conv == direct conv on the zero-dilated, edge-padded input ----
    # Build the patch matrix channel-major ("column = output pixel"), in bf16 from the start.
    # TODO(synk): replace this XLA-side im2col slab with in-kernel streaming of the K*K shifted
    # windows + the s*s sub-convolution decomposition (removes the K^2-larger HBM slab).
    x_t = x.astype(jnp.bfloat16).transpose(1, 0, 2, 3)                  # (Cin, N, H, W)
    Hu, Wu = (H - 1) * s + 1, (W - 1) * s + 1
    x_up = jnp.zeros((Cin, N, Hu, Wu), jnp.bfloat16).at[:, :, ::s, ::s].set(x_t)
    p = K - 1 - pad
    x_padded = jnp.pad(x_up, ((0, 0), (0, 0), (p, p), (p, p)))          # (Cin, N, Hp, Wp)
    cols = [x_padded[:, :, kh:kh + OH, kw:kw + OW].reshape(Cin, M)
            for kh in range(K) for kw in range(K)]
    patches_t = jnp.concatenate(cols, axis=0)                           # (CKK, M), rows (kh,kw,ci)
    patches_t = jnp.pad(patches_t, ((0, ckk_pad - CKK), (0, m_pad - M)))

    # Flipped kernel with matching (kh, kw, ci) ordering, channel-major LHS (Cout_sub, CKKp).
    w_conv = jnp.flip(weight, axis=(2, 3))                              # (Cin, Cout, K, K)
    w_t = w_conv.transpose(2, 3, 0, 1).reshape(CKK, Cout).T             # (Cout, CKK)
    w_t = jnp.pad(w_t, ((0, cout_sub - Cout), (0, ckk_pad - CKK))).astype(jnp.bfloat16)

    # ---- pass 1: MXU matmul (channel-major) + per-channel sum / sumsq accumulation ----
    y_t, psum, pssq = pl.pallas_call(
        _conv_stats_kernel,
        out_shape=(
            jax.ShapeDtypeStruct((cout_sub, m_pad), jnp.float32),
            jax.ShapeDtypeStruct((n_par, cout_sub, 1), jnp.float32),
            jax.ShapeDtypeStruct((n_par, cout_sub, 1), jnp.float32),
        ),
        grid_spec=pltpu.PrefetchScalarGridSpec(
            num_scalar_prefetch=0,
            grid=(n_par, n_inner),
            in_specs=[
                pl.BlockSpec((ckk_pad, tm), lambda pc, i: (0, pc * n_inner + i)),
                pl.BlockSpec((cout_sub, ckk_pad), lambda pc, i: (0, 0)),
            ],
            out_specs=(
                pl.BlockSpec((cout_sub, tm), lambda pc, i: (0, pc * n_inner + i)),
                pl.BlockSpec((None, cout_sub, 1), lambda pc, i: (pc, 0, 0)),   # per-core partial
                pl.BlockSpec((None, cout_sub, 1), lambda pc, i: (pc, 0, 0)),   # per-core partial
            ),
        ),
        compiler_params=pltpu.CompilerParams(
            dimension_semantics=("parallel", "arbitrary"),
            vmem_limit_bytes=VMEM_LIMIT),
    )(patches_t, w_t)

    # ---- finalize batch statistics (tiny XLA ops on (n_par, Cout_sub) partials) ----
    inv_m = 1.0 / float(M)
    ch_sum = jnp.sum(psum, axis=0)[:, 0]                                # (cout_sub,)
    ch_ssq = jnp.sum(pssq, axis=0)[:, 0]
    mean = ch_sum * inv_m
    var = jnp.maximum(ch_ssq * inv_m - mean * mean, 0.0)                # biased batch variance
    # TODO(synk): for very large M or large per-channel offsets, switch to shifted / Welford
    # style accumulation to avoid E[y^2] - E[y]^2 cancellation.
    gamma_p = jnp.pad(gamma.astype(jnp.float32), (0, cout_sub - Cout))
    beta_p = jnp.pad(beta.astype(jnp.float32), (0, cout_sub - Cout))
    g_inv = gamma_p * jax.lax.rsqrt(var + EPS)
    scale = g_inv.reshape(cout_sub, 1)
    shift = (beta_p - mean * g_inv).reshape(cout_sub, 1)

    # ---- pass 2: per-channel scale/shift + activation on the narrow channel-major slab ----
    out_t = pl.pallas_call(
        functools.partial(_bn_act_kernel, activation=activation),
        out_shape=jax.ShapeDtypeStruct((cout_sub, m_pad), jnp.float32),
        grid_spec=pltpu.PrefetchScalarGridSpec(
            num_scalar_prefetch=0,
            grid=(n_tiles,),
            in_specs=[
                pl.BlockSpec((cout_sub, tm), lambda i: (0, i)),
                pl.BlockSpec((cout_sub, 1), lambda i: (0, 0)),
                pl.BlockSpec((cout_sub, 1), lambda i: (0, 0)),
            ],
            out_specs=pl.BlockSpec((cout_sub, tm), lambda i: (0, i)),
        ),
        compiler_params=pltpu.CompilerParams(
            dimension_semantics=("parallel",),
            vmem_limit_bytes=VMEM_LIMIT),
    )(y_t, scale, shift)

    # Channel-major (Cout, N*OH*OW) -> PyTorch NCHW; this swap moves whole contiguous HW planes.
    return out_t[:Cout, :M].reshape(Cout, N, OH, OW).transpose(1, 0, 2, 3)


def reference(x, weight, bias, gamma, beta, stride, pad, activation="relu"):
    """Pure-JAX f32 reference of the same forward semantics (for correctness check)."""
    Cin, Cout, K, _ = weight.shape
    w_conv = jnp.flip(weight, axis=(2, 3)).transpose(1, 0, 2, 3)        # OIHW
    y = jax.lax.conv_general_dilated(
        x, w_conv, window_strides=(1, 1),
        padding=[(K - 1 - pad, K - 1 - pad)] * 2,
        lhs_dilation=(stride, stride),
        dimension_numbers=("NCHW", "OIHW", "NCHW"),
        precision=jax.lax.Precision.HIGHEST)
    y = y + bias[None, :, None, None]
    mean = jnp.mean(y, axis=(0, 2, 3), keepdims=True)
    var = jnp.var(y, axis=(0, 2, 3), keepdims=True)
    z = (y - mean) * jax.lax.rsqrt(var + EPS)
    z = z * gamma[None, :, None, None] + beta[None, :, None, None]
    if activation == "relu":
        return jnp.maximum(z, 0.0)
    return jax.nn.sigmoid(z)


if __name__ == "__main__":
    key = jax.random.PRNGKey(0)

    configs = [
        # (N, Cin, H, W, Cout, K, stride, pad, tm, activation)
        (2, 4, 16, 16, 8, 4, 2, 1, 512, "relu"),     # M=2048 -> 4 tiles (2 per core on v7x)
        (1, 3, 7, 7, 5, 3, 2, 1, 256, "sigmoid"),    # ragged CKK/Cout/M (padding paths)
    ]
    for (N, Cin, H, W, Cout, K, stride, pad, tm, act) in configs:
        key, k_x, k_w, k_b, k_g, k_be = jax.random.split(key, 6)
        # Pre-round conv inputs to bf16 (the MXU-native dtype the kernel feeds the matmul),
        # so the f32 reference differs from the kernel only by accumulation order.
        x = jax.random.normal(k_x, (N, Cin, H, W), jnp.float32)
        x = x.astype(jnp.bfloat16).astype(jnp.float32)
        weight = jax.random.normal(k_w, (Cin, Cout, K, K), jnp.float32) / np.sqrt(Cin * K * K)
        weight = weight.astype(jnp.bfloat16).astype(jnp.float32)
        bias = 0.1 * jax.random.normal(k_b, (Cout,), jnp.float32)
        gamma = 1.0 + 0.1 * jax.random.normal(k_g, (Cout,), jnp.float32)
        beta = 0.1 * jax.random.normal(k_be, (Cout,), jnp.float32)

        out = decoder_module_forward(x, weight, bias, gamma, beta, stride, pad,
                                     activation=act, tm=tm)
        jax.block_until_ready(out)

        OH = (H - 1) * stride - 2 * pad + K
        OW = (W - 1) * stride - 2 * pad + K
        assert out.shape == (N, Cout, OH, OW), out.shape

        ref = reference(x, weight, bias, gamma, beta, stride, pad, act)
        np.testing.assert_allclose(np.asarray(out), np.asarray(ref), rtol=1e-4, atol=1e-4)

    print("KERNEL_OK")
</pallas_src>

<mosaic_0001>
module attributes {stable_mosaic.version = 11 : i64} {
  func.func @_conv_stats_kernel(%arg0: i32, %arg1: i32, %arg2: memref<64x512xbf16, #tpu.memory_space<vmem>>, %arg3: memref<8x64xbf16, #tpu.memory_space<vmem>>, %arg4: memref<8x512xf32, #tpu.memory_space<vmem>>, %arg5: memref<1x8x1xf32, #tpu.memory_space<vmem>>, %arg6: memref<1x8x1xf32, #tpu.memory_space<vmem>>) attributes {dimension_semantics = [#tpu.dimension_semantics<parallel>, #tpu.dimension_semantics<arbitrary>], iteration_bounds = array<i64: 2, 2>, scalar_prefetch = 0 : i64, scratch_operands = 0 : i64, tpu.core_type = #tpu.core_type<tc>, window_params = [{transform_indices = @transform_0, window_bounds = array<i64: 64, 512>}, {pipeline_mode = #tpu.pipeline_mode<synchronous>, transform_indices = @transform_1, window_bounds = array<i64: 8, 64>}, {transform_indices = @transform_2, window_bounds = array<i64: 8, 512>}, {transform_indices = @transform_3, window_bounds = array<i64: 1, 8, 1>}, {transform_indices = @transform_4, window_bounds = array<i64: 1, 8, 1>}]} {
    %c0 = arith.constant 0 : index
    %c0_0 = arith.constant 0 : index
    %0 = vector.load %arg3[%c0, %c0_0] : memref<8x64xbf16, #tpu.memory_space<vmem>>, vector<8x64xbf16>
    %c0_1 = arith.constant 0 : index
    %c0_2 = arith.constant 0 : index
    %1 = vector.load %arg2[%c0_1, %c0_2] : memref<64x512xbf16, #tpu.memory_space<vmem>>, vector<64x512xbf16>
    %cst = arith.constant dense<0.000000e+00> : vector<8x512xf32>
    %2 = tpu.matmul %0, %1, %cst {dimension_numbers = #tpu.dot_dimension_numbers<[1], [0], [0], [1], [0, 0, 1, 1], [], []>} : vector<8x64xbf16>, vector<64x512xbf16>, vector<8x512xf32> -> vector<8x512xf32>
    %c0_3 = arith.constant 0 : index
    %c0_4 = arith.constant 0 : index
    %3 = vector.load %arg4[%c0_3, %c0_4] : memref<8x512xf32, #tpu.memory_space<vmem>>, vector<8x512xf32>
    tpu.vector_store %arg4[%c0_3, %c0_4], %2 {strides = array<i32>} : memref<8x512xf32, #tpu.memory_space<vmem>>, vector<8x512xf32>,
    %c0_i32 = arith.constant 0 : i32
    %4 = arith.cmpi eq, %arg1, %c0_i32 : i32
    %5 = arith.extui %4 : i1 to i32
    %c0_i32_5 = arith.constant 0 : i32
    %6 = arith.cmpi ne, %5, %c0_i32_5 : i32
    scf.if %6 {
      %cst_20 = arith.constant 0.000000e+00 : f32
      %24 = vector.broadcast %cst_20 : f32 to vector<8x1xf32>
      %c0_21 = arith.constant 0 : index
      %c0_22 = arith.constant 0 : index
      %c0_23 = arith.constant 0 : index
      %25 = vector.load %arg5[%c0_21, %c0_22, %c0_23] : memref<1x8x1xf32, #tpu.memory_space<vmem>>, vector<1x8x1xf32>
      %26 = vector.shape_cast %25 : vector<1x8x1xf32> to vector<8x1xf32>
      %27 = vector.shape_cast %24 : vector<8x1xf32> to vector<1x8x1xf32>
      tpu.vector_store %arg5[%c0_21, %c0_22, %c0_23], %27 {strides = array<i32>} : memref<1x8x1xf32, #tpu.memory_space<vmem>>, vector<1x8x1xf32>,
      %cst_24 = arith.constant 0.000000e+00 : f32
      %28 = vector.broadcast %cst_24 : f32 to vector<8x1xf32>
      %c0_25 = arith.constant 0 : index
      %c0_26 = arith.constant 0 : index
      %c0_27 = arith.constant 0 : index
      %29 = vector.load %arg6[%c0_25, %c0_26, %c0_27] : memref<1x8x1xf32, #tpu.memory_space<vmem>>, vector<1x8x1xf32>
      %30 = vector.shape_cast %29 : vector<1x8x1xf32> to vector<8x1xf32>
      %31 = vector.shape_cast %28 : vector<8x1xf32> to vector<1x8x1xf32>
      tpu.vector_store %arg6[%c0_25, %c0_26, %c0_27], %31 {strides = array<i32>} : memref<1x8x1xf32, #tpu.memory_space<vmem>>, vector<1x8x1xf32>,
    } else {
    }
    %c0_6 = arith.constant 0 : index
    %c0_7 = arith.constant 0 : index
    %c0_8 = arith.constant 0 : index
    %7 = vector.load %arg5[%c0_6, %c0_7, %c0_8] : memref<1x8x1xf32, #tpu.memory_space<vmem>>, vector<1x8x1xf32>
    %8 = vector.shape_cast %7 : vector<1x8x1xf32> to vector<8x1xf32>
    %cst_9 = arith.constant dense<0.000000e+00> : vector<8xf32>
    %9 = vector.multi_reduction <add>, %2, %cst_9 [1] : vector<8x512xf32> to vector<8xf32>
    %10 = vector.shape_cast %9 : vector<8xf32> to vector<8x1xf32>
    %11 = arith.addf %8, %10 : vector<8x1xf32>
    %c0_10 = arith.constant 0 : index
    %c0_11 = arith.constant 0 : index
    %c0_12 = arith.constant 0 : index
    %12 = vector.load %arg5[%c0_10, %c0_11, %c0_12] : memref<1x8x1xf32, #tpu.memory_space<vmem>>, vector<1x8x1xf32>
    %13 = vector.shape_cast %12 : vector<1x8x1xf32> to vector<8x1xf32>
    %14 = vector.shape_cast %11 : vector<8x1xf32> to vector<1x8x1xf32>
    tpu.vector_store %arg5[%c0_10, %c0_11, %c0_12], %14 {strides = array<i32>} : memref<1x8x1xf32, #tpu.memory_space<vmem>>, vector<1x8x1xf32>,
    %c0_13 = arith.constant 0 : index
    %c0_14 = arith.constant 0 : index
    %c0_15 = arith.constant 0 : index
    %15 = vector.load %arg6[%c0_13, %c0_14, %c0_15] : memref<1x8x1xf32, #tpu.memory_space<vmem>>, vector<1x8x1xf32>
    %16 = vector.shape_cast %15 : vector<1x8x1xf32> to vector<8x1xf32>
    %17 = arith.mulf %2, %2 : vector<8x512xf32>
    %cst_16 = arith.constant dense<0.000000e+00> : vector<8xf32>
    %18 = vector.multi_reduction <add>, %17, %cst_16 [1] : vector<8x512xf32> to vector<8xf32>
    %19 = vector.shape_cast %18 : vector<8xf32> to vector<8x1xf32>
    %20 = arith.addf %16, %19 : vector<8x1xf32>
    %c0_17 = arith.constant 0 : index
    %c0_18 = arith.constant 0 : index
    %c0_19 = arith.constant 0 : index
    %21 = vector.load %arg6[%c0_17, %c0_18, %c0_19] : memref<1x8x1xf32, #tpu.memory_space<vmem>>, vector<1x8x1xf32>
    %22 = vector.shape_cast %21 : vector<1x8x1xf32> to vector<8x1xf32>
    %23 = vector.shape_cast %20 : vector<8x1xf32> to vector<1x8x1xf32>
    tpu.vector_store %arg6[%c0_17, %c0_18, %c0_19], %23 {strides = array<i32>} : memref<1x8x1xf32, #tpu.memory_space<vmem>>, vector<1x8x1xf32>,
    return
  }
  func.func @transform_0(%arg0: i32, %arg1: i32) -> (i32, i32) {
    %c2_i32 = arith.constant 2 : i32
    %0 = arith.muli %arg0, %c2_i32 : i32
    %1 = arith.addi %0, %arg1 : i32
    %c0_i32 = arith.constant 0 : i32
    %c0_i32_0 = arith.constant 0 : i32
    return %c0_i32, %1 : i32, i32
  }
  func.func @transform_1(%arg0: i32, %arg1: i32) -> (i32, i32) {
    %c0_i32 = arith.constant 0 : i32
    %c0_i32_0 = arith.constant 0 : i32
    %c0_i32_1 = arith.constant 0 : i32
    return %c0_i32, %c0_i32_0 : i32, i32
  }
  func.func @transform_2(%arg0: i32, %arg1: i32) -> (i32, i32) {
    %c2_i32 = arith.constant 2 : i32
    %0 = arith.muli %arg0, %c2_i32 : i32
    %1 = arith.addi %0, %arg1 : i32
    %c0_i32 = arith.constant 0 : i32
    %c0_i32_0 = arith.constant 0 : i32
    return %c0_i32, %1 : i32, i32
  }
  func.func @transform_3(%arg0: i32, %arg1: i32) -> (i32, i32, i32) {
    %c0_i32 = arith.constant 0 : i32
    %c0_i32_0 = arith.constant 0 : i32
    %c0_i32_1 = arith.constant 0 : i32
    return %arg0, %c0_i32, %c0_i32_0 : i32, i32, i32
  }
  func.func @transform_4(%arg0: i32, %arg1: i32) -> (i32, i32, i32) {
    %c0_i32 = arith.constant 0 : i32
    %c0_i32_0 = arith.constant 0 : i32
    %c0_i32_1 = arith.constant 0 : i32
    return %arg0, %c0_i32, %c0_i32_0 : i32, i32, i32
  }
}

</mosaic_0001>

<bundles_post_ra>
// kernel: tpu_custom_call.1
= control target key start
LH: loop header
LB: loop body
LE: loop exit
PB: predicated region body
PF: predicated region fallthrough
CT: control target
= control target key end

     0   :  { %s1275_s0 = inlined_call_operand.hbm [shape: bf16[64,2048], index: 0, kind: input, shape index: {}]   ;;  %s1276_s1 = inlined_call_operand.hbm [shape: bf16[8,64], index: 1, kind: input, shape index: {}]   ;;  %s1277_s2 = inlined_call_operand.hbm [shape: f32[8,2048], index: 2, kind: output, shape index: {0}]   ;;  %s1278_s3 = inlined_call_operand.vmem [shape: f32[2,8,1], index: 3, kind: output, shape index: {1}]   ;;  %s1279_s4 = inlined_call_operand.vmem [shape: f32[2,8,1], index: 4, kind: output, shape index: {2}]  }
   0x1   :  { %1289 = sst [smem:[#allocation18_spill]] %s1276_s1 }
   0x2   :  { %1290 = sst [smem:[#allocation19_spill]] %s1277_s2 }
   0x3   :  { %10 = vsyncpa [#allocation3], 0 }
   0x4   :  { %12 = vsyncpa [#allocation3 + $0x1], 0 }
   0x5   :  { %13 = vsyncpa [#allocation6], 0 }
   0x6   :  { %14 = vsyncpa [#allocation4], 0 }
   0x7   :  { %16 = vsyncpa [#allocation4 + $0x1], 0  ;;  %s1043_s15 = smov 0   ;;  %s1045_s16 = smov 0  }
   0x8   :  { %s1047_s17 = smov 0   ;;  %s1049_s18 = smov 0  }
   0x9   :  { %s1051_s19 = smov 0   ;;  %s1053_s20 = smov 0  }
   0xa   :  { %s1055_s21 = smov 0   ;;  %s1057_s22 = smov 0  }
   0xb LB: > { %1291 = sst [smem:[#allocation11_spill]] %s983_s15  ;;  %s644_s23 = sadd.s32 4294967295, %s1011_s22   ;;  %s1011_s22 = sphi %s1057_s22, %s22_s22   ;;  %s1007_s21 = sphi %s1055_s21, %s1321_s21   ;;  %s1003_s20 = sphi %s1053_s20, %s1320_s20   ;;  %s999_s19 = sphi %s1051_s19, %s1316_s19   ;;  %s995_s18 = sphi %s1049_s18, %s1315_s18   ;;  %s991_s17 = sphi %s1047_s17, %s1319_s17   ;;  %s987_s16 = sphi %s1045_s16, %s1318_s16   ;;  %s983_s15 = sphi %s1043_s15, %s1317_s15  }
   0xc   : > { %1292 = sst [smem:[#allocation12_spill]] %s995_s18  ;;  %s645_s24 = sadd.s32 4294967294, %s1011_s22  }
   0xd   : > { %1293 = sst [smem:[#allocation13_spill]] %s1003_s20  ;;  %p52_p0 = scmp.ne.s32.totalorder %s991_s17, %s987_s16 }
   0xe   : > { %1294 = sst [smem:[#allocation14_spill]] %s1007_s21  ;;  %p53_p1 = scmp.eq.s32.totalorder %s1011_s22, 0 }
   0xf   : > { %1295 = sst [smem:[#allocation15_spill]] %s1011_s22  ;;  %p58_p2 = scmp.ne.s32.totalorder %s987_s16, %s983_s15 }
  0x10   : > { %p1091_p3 = scmp.eq.s32.totalorder %s644_s23, 0  ;;  %p107_p4 = scmp.eq.s32.totalorder %s644_s23, 3 }
  0x11   : > { %p1095_p5 = por %p53_p1, %p52_p0  ;;  %p113_p6 = scmp.eq.s32.totalorder %s645_s24, 3 }
  0x12   : > { %p1101_p7 = por %p1091_p3, %p58_p2  ;;  %p1105_p8 = por %p107_p4, %p52_p0 }
  0x13   : > { %p1109_p9 = por %p113_p6, %p58_p2  ;;  %p650_p10 = scmp.ge.s32.totalorder %s1011_s22, 1 }
  0x14   : > { %s1299_s29 = scalar_select %p1105_p8, 1, 0 }
  0x15   : > { %s1301_s30 = scalar_select %p1109_p9, 1, 0 }
  0x16   : > { %1300 = sst [smem:[#allocation16_spill]] %s1299_s29  ;;  %p172_p11 = scmp.lt.s32.totalorder %s1011_s22, 5 }
  0x17   : > { %1302 = sst [smem:[#allocation17_spill]] %s1301_s30  ;;  %s1013_s9 = smov [#allocation5]  }
  0x18   : > { %s1303_s1 = sld [smem:[#allocation18_spill]]  ;;  %p1118_p12 = pnand %p650_p10, %p172_p11 }
  0x19   : > { %s186_s10 = sshll.u32 %s1013_s9, 4  ;;  %p777_p0 = scmp.lt.s32.totalorder %s1011_s22, 4  ;;  %s187_s10 = int_to_ptr.vmem [resolvable:$true] %s186_s10 }
  0x1a   : > { %p764_p13 = pneg %p1118_p12  ;;  %s31_s12 = sadd.s32 1, %s1003_s20 }
  0x1b   : > { %p1129_p2 = pnand %p777_p0, %p1095_p5  ;;  %p32_p4 = scmp.ge.s32.totalorder %s31_s12, 2 }
  0x1c   : > { %p765_p1 = pnand %p764_p13, %p1091_p3  ;;  %s34_s13 = sadd.s32 1, %s1007_s21 }
  0x1d   : > { %s646_s14 = sshll.u32 %s1007_s21, 1  ;;  %s197_s23 = sand.u32 1, %s991_s17  }
  0x1e   : > { %s184_s7 = sshll.u32 %s1303_s1, 4  ;;  %s1323_s12 = smov (%p32_p4, %s31_s12), 0  ;;  %s185_s7 = int_to_ptr.hbm [resolvable:$true] %s184_s7 }
  0x1f   : > { %767 = dma.hbm_to_vmem [thread:$0]  (!%p765_p1), %s185_s7, 64, %s187_s10, [#allocation6]  }
  0x20   : > { %s1325_s13 = smov (!%p32_p4, %s34_s13), %s1007_s21  ;;  %s39_s24 = sadd.s32 %s1003_s20, %s646_s14 }
  0x21   : > { %p36_p6 = scmp.ge.s32.totalorder %s1325_s13, 2  ;;  %s653_s5 = sshll.u32 %s197_s23, 7 }
  0x22   : > { %s738_s27 = sshll.u32 %s39_s24, 4  ;;  %s201_s10 = scalar_lea.vmem [#allocation2], %s653_s5 }
  0x23   : > { %s1327_s13 = smov (%p36_p6, %s1325_s13), 0  ;;  %s208_s7 = scalar_lea.hbm %s1275_s0, %s738_s27 }
  0x24   : > { %s211_s25 = sshll.u32 %s201_s10, 4  ;;  %s647_s1 = sshll.u32 %s1327_s13, 1  ;;  %s212_s25 = int_to_ptr.vmem [resolvable:$true] %s211_s25 }
  0x25   : > { %s209_s30 = sshll.u32 %s208_s7, 4  ;;  %s41_s15 = sadd.s32 %s647_s1, %s1323_s12  ;;  %s210_s30 = int_to_ptr.hbm [resolvable:$true] %s209_s30 }
  0x26   : > { %s42_s21 = ssub.s32 %s39_s24, %s41_s15  ;;  %s1306_s14 = sadd.s32 1, %s991_s17 }
  0x27   : > { %p43_p5 = scmp.eq.s32.totalorder %s42_s21, 0  ;;  %s198_s22 = scalar_lea.sflag [#allocation3], %s197_s23 }
  0x28   : > { %s1014_s2 = smov 1024   ;;  %s1015_s29 = smov 256  }
  0x29   : > { %s1151_s20 = scalar_select %p43_p5, %s991_s17, %s1306_s14  }
  0x2a   : > { %s1016_s18 = smov 16   ;;  %223 = sbr.rel (%p1118_p12) target bundleno = 356 (0x164), region = 28 }
  0x2b   : > { %771 = dma.hbm_to_vmem [thread:$0]  (!%p1129_p2), %s210_s30, 2048, %s212_s25, %s198_s22, %s1014_s2, %s1015_s29, %s1016_s18  }
  0x2c   : > { %s1158_s5 = sand.u32 (!%p1118_p12), 1, %s987_s16  }
  0x2d   : > { %s658_s1 = sshll.u32 (!%p1118_p12), %s1158_s5, 7  ;;  %s226_s15 = scalar_lea.sflag (!%p1118_p12), [#allocation3], %s1158_s5 }
  0x2e   : > { %s1162_s21 = scalar_lea.vmem (!%p1118_p12), [#allocation2], %s658_s1 }
  0x2f   : > { %970 = dma.done.wait (%p1101_p7), %s226_s15, 2048  }
  0x30   : > { %972 = vsyncadd (%p1101_p7), %s226_s15, 4294965248 }
  0x31   : > { %974 = dma.done.wait (%p1091_p3), [#allocation6], 64  }
  0x32   : > { %976 = vsyncadd (%p1091_p3), [#allocation6], 4294967232  ;;  %p274_p10 = scmp.lt.s32.totalorder %s999_s19, 1  ;;  %v713_v0 = vld [vmem:[%s1162_s21 + $0x60] sm:$0xf]  ;;  %vm380_vm0 = vcmask 523264  }
  0x33   : > { %v753_v1 = vld [vmem:[%s1162_s21 + $0x6c] sm:$0xf0]  ;;  %v751_v2 = vld [vmem:[%s1162_s21 + $0x64] sm:$0xf]  ;;  %v715_v4 = vld [vmem:[%s1162_s21 + $0x70] sm:$0xf0] }
  0x34   : > { %s275_s2 = scalar_select %p274_p10, %s999_s19, 1  ;;  %v714_v3 = vor.u32 %v753_v1, %v713_v0  ;;  %v721_v5 = vld [vmem:[%s1162_s21 + $0x68] sm:$0xf]  ;;  %v754_v6 = vld [vmem:[%s1162_s21 + $0x74] sm:$0xf0]  ;;  %v718_v7 = vor.u32 %v751_v2, %v715_v4 }
  0x35   : > { %v722_v8 = vor.u32 %v754_v6, %v721_v5  ;;  %v752_v9 = vld [vmem:[%s1162_s21 + $0x6c] sm:$0xf]  ;;  %v723_v10 = vld [vmem:[%s1162_s21 + $0x78] sm:$0xf0]  ;;  %v697_v11 = vld [vmem:[%s1162_s21 + $0x40] sm:$0xf] }
  0x36   : > { %s661_s18 = sshll.u32 %s275_s2, 3  ;;  %388 = vmatpush.bf16.msra.mxu0 %v714_v3  ;;  %v726_v12 = vor.u32 %v752_v9, %v723_v10  ;;  %v749_v13 = vld [vmem:[%s1162_s21 + $0x4c] sm:$0xf0]  ;;  %v747_v14 = vld [vmem:[%s1162_s21 + $0x44] sm:$0xf]  ;;  %401 = vmatpush.bf16.msra.mxu1 %v718_v7  ;;  %s660_s8 = sshll.u32 %s1158_s5, 5 }
  0x37   : > { %s1177_s28 = scalar_lea.vmem %s1278_s3, %s661_s18  ;;  %s1182_s30 = scalar_lea.vmem %s1279_s4, %s661_s18  ;;  %v699_v15 = vld [vmem:[%s1162_s21 + $0x50] sm:$0xf0]  ;;  %414 = vmatpush.bf16.msra.mxu2 %v722_v8  ;;  %v698_v16 = vor.u32 %v749_v13, %v697_v11  ;;  %v705_v18 = vld [vmem:[%s1162_s21 + $0x48] sm:$0xf]  ;;  %v750_v19 = vld [vmem:[%s1162_s21 + $0x54] sm:$0xf0] }
  0x38   : > { %v702_v17 = vor.u32 %v747_v14, %v699_v15  ;;  %v748_v20 = vld [vmem:[%s1162_s21 + $0x4c] sm:$0xf]  ;;  %427 = vmatpush.bf16.msra.mxu3 %v726_v12  ;;  %v706_v21 = vor.u32 %v750_v19, %v705_v18  ;;  %v707_v22 = vld [vmem:[%s1162_s21 + $0x58] sm:$0xf0]  ;;  %v681_v23 = vld [vmem:[%s1162_s21 + $0x20] sm:$0xf] }
  0x39   : > { %v745_v24 = vld [vmem:[%s1162_s21 + $0x2c] sm:$0xf0]  ;;  %v710_v25 = vor.u32 %v748_v20, %v707_v22  ;;  %v743_v26 = vld [vmem:[%s1162_s21 + $0x24] sm:$0xf]  ;;  %v683_v27 = vld [vmem:[%s1162_s21 + $0x30] sm:$0xf0] }
  0x3a   : > { %v689_v28 = vld [vmem:[%s1162_s21 + $0x28] sm:$0xf]  ;;  %389 = vmatpush.bf16.msra.mxu0 %v698_v16  ;;  %v682_v29 = vor.u32 %v745_v24, %v681_v23  ;;  %v746_v30 = vld [vmem:[%s1162_s21 + $0x34] sm:$0xf0]  ;;  %v744_v31 = vld [vmem:[%s1162_s21 + $0x2c] sm:$0xf]  ;;  %402 = vmatpush.bf16.msra.mxu1 %v702_v17  ;;  %v686_v33 = vor.u32 %v743_v26, %v683_v27 }
  0x3b   : > { %v691_v32 = vld [vmem:[%s1162_s21 + $0x38] sm:$0xf0]  ;;  %415 = vmatpush.bf16.msra.mxu2 %v706_v21  ;;  %v690_v34 = vor.u32 %v746_v30, %v689_v28  ;;  %v665_v35 = vld [vmem:[%s1162_s21] sm:$0xf]  ;;  %v741_v36 = vld [vmem:[%s1162_s21 + $0xc] sm:$0xf0] }
  0x3c   : > { %v739_v37 = vld [vmem:[%s1162_s21 + $0x4] sm:$0xf]  ;;  %428 = vmatpush.bf16.msra.mxu3 %v710_v25  ;;  %v694_v38 = vor.u32 %v744_v31, %v691_v32  ;;  %v667_v39 = vld [vmem:[%s1162_s21 + $0x10] sm:$0xf0]  ;;  %v673_v40 = vld [vmem:[%s1162_s21 + $0x8] sm:$0xf]  ;;  %v666_v44 = vor.u32 %v741_v36, %v665_v35 }
  0x3d   : > { %v742_v41 = vld [vmem:[%s1162_s21 + $0x14] sm:$0xf0]  ;;  %v740_v42 = vld [vmem:[%s1162_s21 + $0xc] sm:$0xf]  ;;  %v675_v43 = vld [vmem:[%s1162_s21 + $0x18] sm:$0xf0]  ;;  %v670_v45 = vor.u32 %v739_v37, %v667_v39 }
  0x3e   : > { %390 = vmatpush.bf16.msra.mxu0 %v682_v29  ;;  %403 = vmatpush.bf16.msra.mxu1 %v686_v33  ;;  %v674_v46 = vor.u32 %v742_v41, %v673_v40  ;;  %v678_v47 = vor.u32 %v740_v42, %v675_v43  ;;  %v283_v48 = vld [vmem:[#allocation5] sm:$0xf]  ;;  %s1217_s11 = scalar_lea.vmem [#allocation7], %s660_s8  ;;  %s1307_s23 = sld [smem:[#allocation12_spill]] }
  0x3f   : > { %416 = vmatpush.bf16.msra.mxu2 %v690_v34 }
  0x40   : > { %429 = vmatpush.bf16.msra.mxu3 %v694_v38 }
  0x42   : > { %391 = vmatpush.bf16.msra.mxu0 %v666_v44  ;;  %404 = vmatpush.bf16.msra.mxu1 %v670_v45 }
  0x43   : > { %417 = vmatpush.bf16.msra.mxu2 %v674_v46 }
  0x44   : > { %430 = vmatpush.bf16.msra.mxu3 %v678_v47  ;;  %p731_p3 = scmp.ne.s32.totalorder %s1307_s23, 0 }
  0x45   : > { %727 = vmatmul.msk.bf16.vlgmr.msra.gmra.mxu0 %vm380_vm0, %v283_v48  ;;  %728 = vmatmul.msk.bf16.vlgmr.msra.gmra.mxu1 %vm380_vm0, %v283_v48 }
  0x46   : > { %729 = vmatmul.msk.bf16.vlgmr.msra.gmra.mxu2 %vm380_vm0, %v283_v48 }
  0x47   : > { %730 = vmatmul.msk.bf16.vlgmr.msra.gmra.mxu3 %vm380_vm0, %v283_v48 }
  0xc2   : > { %v393_v49 = vpop.f32.mrf.mxu0  ;;  %v406_v50 = vpop.f32.mrf.mxu1 }
  0xc3   : > { %436 = vst [vmem:[%s1217_s11] sm:$0xff] %v393_v49 }
  0xc4   : > { %437 = vst [vmem:[%s1217_s11 + $0x8] sm:$0xff] %v406_v50 }
  0xc9   : > { %v419_v51 = vpop.f32.mrf.mxu2 }
  0xca   : > { %438 = vst [vmem:[%s1217_s11 + $0x10] sm:$0xff] %v419_v51  ;;  %v432_v52 = vpop.f32.mrf.mxu3  ;;  %v395_v53 = vpop.f32.mrf.mxu0 }
  0xcb   : > { %439 = vst [vmem:[%s1217_s11 + $0x18] sm:$0xff] %v432_v52  ;;  %v408_v54 = vpop.f32.mrf.mxu1 }
  0xce   : > { %443 = sbr.rel (%p731_p3) target bundleno = 214 (0xd6), region = 40 }
  0xd1   : > { %v421_v55 = vpop.f32.mrf.mxu2 }
  0xd2   : > { %v434_v56 = vpop.f32.mrf.mxu3 }
  0xd3   : > { %vm444_vm1 = vcmask 7168   ;;  %v1017_v57 = vmov 0.0  }
  0xd4   : > { %445 = vst.msk [vmem:[%s1177_s28] sm:$0xff] %vm444_vm1, %v1017_v57 }
  0xd5   : > { %446 = vst.msk [vmem:[%s1182_s30] sm:$0xff] %vm444_vm1, %v1017_v57 }
  0xd6 PF: > { %v448_v58 = vadd.f32 %v406_v50, %v393_v49  ;;  %s1308_s24 = sld [smem:[#allocation12_spill]]  ;;  %v457_v59 = vmul.f32 %v393_v49, %v393_v49  ;;  %v458_v60 = vmul.f32 %v406_v50, %v406_v50  ;;  %s733_s27 = sshll.u32 %s999_s19, 1  ;;  %v459_v62 = vmul.f32 %v419_v51, %v419_v51 }
  0xd7   : > { %s492_s10 = sshll.u32 %s1217_s11, 4  ;;  %s1310_s15 = sld [smem:[#allocation19_spill]]  ;;  %v460_v1 = vmul.f32 %v432_v52, %v432_v52  ;;  %s493_s10 = int_to_ptr.vmem [resolvable:$true] %s492_s10 }
  0xd8   : > { %v449_v61 = vadd.f32 %v448_v58, %v419_v51  ;;  %v461_v63 = vadd.f32 %v458_v60, %v457_v59  ;;  %s469_s22 = scalar_lea.sflag [#allocation4], %s1158_s5 }
  0xda   : > { %v450_v0 = vadd.f32 %v449_v61, %v432_v52  ;;  %v462_v2 = vadd.f32 %v461_v63, %v459_v62 }
  0xdc   : > { %s485_s6 = sadd.s32 %s1308_s24, %s733_s27  ;;  %451 = vadd.xlane.f32.xlu0 %v450_v0 }
  0xdd   : > { %s755_s7 = sshll.u32 %s485_s6, 5  ;;  %s1311_s2 = smov %s1310_s15 }
  0xde   : > { %s490_s21 = scalar_lea.hbm %s1310_s15, %s755_s7  ;;  %s929_s8 = scalar_lea.hbm %s1311_s2, 128 }
  0xdf   : > { %s494_s18 = sshll.u32 %s490_s21, 4  ;;  %s495_s18 = int_to_ptr.hbm [resolvable:$true] %s494_s18 }
  0xe0   : > { %s923_s19 = sshra.s32 %s495_s18, 4  ;;  %s924_s19 = int_to_ptr.hbm [resolvable:$true] %s923_s19 }
  0xe1   : > { %s925_s25 = scalar_lea.hbm %s924_s19, 32  ;;  %p930_p13 = scmp.lt.s32.totalorder %s924_s19, %s1311_s2 }
  0xe2   : > { %p926_p7 = scmp.ne.s32.totalorder %s924_s19, %s925_s25  ;;  %p931_p0 = scmp.lt.s32.totalorder %s929_s8, %s925_s25 }
  0xe4   : > { %p927_p11 = pnand %p926_p7, %p1105_p8  ;;  %p932_p1 = por %p931_p0, %p930_p13 }
  0xe6   : > { %p928_p12 = pneg %p927_p11 }
  0xe8   : > { %p933_p2 = pnand %p932_p1, %p928_p12 }
  0xea   : > { %936 = shalt.err (!%p933_p2)
}
  0xeb   : > { %762 = dma.vmem_to_hbm [thread:$0]  (%p1105_p8), %s493_s10, 512, %s495_s18, %s469_s22   ;;  %v463_v3 = vadd.f32 %v462_v2, %v460_v1  ;;  %v447_v4 = vld [vmem:[%s1177_s28] sm:$0xff]  ;;  %vm454_vm2 = vcmask 7168  }
  0xec   : > { %v456_v7 = vld [vmem:[%s1182_s30] sm:$0xff] }
  0xed   : > { %464 = vadd.xlane.f32.xlu0 %v463_v3 }
 0x14f   : > { %v452_v5 = vpop.xlane.xlu0 %451 }
 0x150   : > { %v453_v6 = vadd.f32 %v452_v5, %v447_v4 }
 0x152   : > { %455 = vst.msk [vmem:[%s1177_s28] sm:$0xff] %vm454_vm2, %v453_v6 }
 0x160   : > { %v465_v8 = vpop.xlane.xlu0 %464 }
 0x161   : > { %v466_v9 = vadd.f32 %v465_v8, %v456_v7 }
 0x163   : > { %467 = vst.msk [vmem:[%s1182_s30] sm:$0xff] %vm454_vm2, %v466_v9 }
 0x164 PF: > { %s1312_s5 = sld [smem:[#allocation15_spill]] }
 0x165   : > { %s1313_s24 = sld [smem:[#allocation11_spill]] }
 0x16a   : > { %p779_p4 = scmp.ge.s32.totalorder %s1312_s5, 2 }
 0x16b   : > { %s512_s6 = sand.u32 1, %s1313_s24  }
 0x16c   : > { %p773_p6 = pnand %p779_p4, %p1109_p9  ;;  %s513_s9 = scalar_lea.sflag [#allocation4], %s512_s6 }
 0x16e   : > { %p774_p8 = pneg %p773_p6 }
 0x170   : > { %978 = dma.done.wait (%p774_p8), %s513_s9, 512  }
 0x171   : > { %980 = vsyncadd (%p774_p8), %s513_s9, 4294966784  ;;  %s22_s22 = sadd.s32 1, %s1312_s5   ;;  %s1315_s18 = sld [smem:[#allocation13_spill]] }
 0x172   : > { %p19_p5 = scmp.ge.s32.totalorder %s22_s22, 6   ;;  %s1316_s19 = sld [smem:[#allocation14_spill]] }
 0x173   : > { %s1317_s15 = smov %s987_s16  ;;  %s1318_s16 = smov %s991_s17 }
 0x174   : > { %s1319_s17 = smov %s1151_s20  ;;  %s1320_s20 = smov %s1323_s12 }
 0x175   : > { %s1321_s21 = smov %s1327_s13  ;;  %21 = sbr.rel (!%p19_p5) target bundleno = 11 (0xb), region = 105 }
 0x17a   :  { %533 = vsyncpa [#allocation3], 1 }
 0x17b   :  { %535 = vsyncpa [#allocation3 + $0x1], 1 }
 0x17c   :  { %536 = vsyncpa [#allocation6], 1 }
 0x17d   :  { %537 = vsyncpa [#allocation4], 1 }
 0x17e   :  { %539 = vsyncpa [#allocation4 + $0x1], 1 }

</bundles_post_ra>
